<compile_context>
chip_gen: v7x
topology: tpu7x:2x2x1
jax: 0.10.0
libtpu: 0.0.40
codegen_flags: <defaults>
</compile_context>

<pallas_src>
import functools

import jax
import jax.numpy as jnp
from jax.experimental import pallas as pl
from jax.experimental.pallas import tpu as pltpu


def _roll_kernel(shift_ref, x_ref, o_ref, *, w):
    # shift_ref: int32[3] in SMEM = [sw, shift_a, shift_b] (all pre-mod-reduced)
    #   sw      = column shift mod W
    #   shift_a = (sh*W + sw)            mod H*W   -> correct lanes with col >= sw
    #   shift_b = (sh*W + sw + H*W - W)  mod H*W   -> correct lanes with col <  sw
    # x_ref / o_ref: (cb, H*W) rows of flattened (H, W) planes.
    sw = shift_ref[0]
    shift_a = shift_ref[1]
    shift_b = shift_ref[2]

    x = x_ref[...]
    y_a = pltpu.roll(x, shift_a, axis=1)   # XLU dynamic lane rotate
    y_b = pltpu.roll(x, shift_b, axis=1)   # XLU dynamic lane rotate

    col = jax.lax.broadcasted_iota(jnp.int32, x.shape, 1) % w
    o_ref[...] = jnp.where(col < sw, y_b, y_a)


def _choose_rows_per_block(nc, hw, itemsize):
    """Rows (flattened planes) per grid step."""
    # Packed-sublane granularity: 8 rows for 32-bit, 16 for bf16, 32 for int8/fp8.
    sub = max(8, 32 // max(1, itemsize))
    # ~1 MiB input blocks: amortizes the ~0.35 us per-grid-step overhead while
    # keeping in+out double-buffered footprint (~4 MiB) well inside the 16 MiB
    # scoped-VMEM default on v5e (32 MiB on v6e/v7x).
    target_bytes = 1 << 20
    cb = max(sub, ((target_bytes // max(1, hw * itemsize)) // sub) * sub)
    # Keep >= 4 grid steps (>= 2 pipelined steps per v7x TensorCore) when there
    # is enough work, so DMAs on both cores stay hidden behind compute.
    if nc >= 4 * sub:
        cb = min(cb, max(sub, ((nc // 4) // sub) * sub))
    if cb >= nc:
        return nc  # single full block (block dim == full array dim is legal)
    return cb


def random_roll(x, roll, key):
    """Pallas equivalent of RandomRoll(roll).forward(x) for NCHW input x.

    The two `random.randint(-roll, roll)` draws of the torch module are taken
    deterministically from `key`, range-reduced, and handed to the kernel as a
    tiny scalar-prefetch array; the kernel itself is pure data movement.
    """
    N, C, H, W = x.shape
    nc, hw = N * C, H * W
    itemsize = jnp.dtype(x.dtype).itemsize

    kh, kw = jax.random.split(key)
    shift_h = jax.random.randint(kh, (), -roll, roll + 1, dtype=jnp.int32)
    shift_w = jax.random.randint(kw, (), -roll, roll + 1, dtype=jnp.int32)
    sh = jnp.mod(shift_h, H).astype(jnp.int32)  # range-reduced, non-negative
    sw = jnp.mod(shift_w, W).astype(jnp.int32)

    # out[i, j] = x[(i - sh) mod H, (j - sw) mod W]
    # Flattened (l = i*W + j):
    #   col >= sw : out_flat[l] = x_flat[(l - sh*W - sw)      mod HW]
    #   col <  sw : out_flat[l] = x_flat[(l - sh*W - sw + W)  mod HW]
    shift_a = (sh * W + sw).astype(jnp.int32)              # in [0, hw)
    shift_b = jnp.mod(shift_a + (hw - W), hw).astype(jnp.int32)
    shifts = jnp.stack([sw, shift_a, shift_b]).astype(jnp.int32)

    x_flat = x.reshape(nc, hw)
    cb = _choose_rows_per_block(nc, hw, itemsize)
    grid = (pl.cdiv(nc, cb),)

    kernel = functools.partial(_roll_kernel, w=W)

    cost = pl.CostEstimate(
        flops=3 * nc * hw,            # mod + compare + select (VPU)
        transcendentals=0,
        bytes_accessed=2 * nc * hw * itemsize,
    )

    out_flat = pl.pallas_call(
        kernel,
        out_shape=jax.ShapeDtypeStruct((nc, hw), x.dtype),
        grid_spec=pltpu.PrefetchScalarGridSpec(
            num_scalar_prefetch=1,
            grid=grid,
            in_specs=[pl.BlockSpec((cb, hw), lambda i, s: (i, 0))],
            out_specs=pl.BlockSpec((cb, hw), lambda i, s: (i, 0)),
        ),
        compiler_params=pltpu.CompilerParams(
            dimension_semantics=("parallel",),
        ),
        cost_estimate=cost,
    )(shifts, x_flat)

    return out_flat.reshape(N, C, H, W), (shift_h, shift_w)


if __name__ == "__main__":
    key = jax.random.PRNGKey(0)
    k_data, k_roll = jax.random.split(key)

    # Small NCHW input consistent with the module's forward.
    N, C, H, W = 2, 4, 16, 16
    x = jax.random.normal(k_data, (N, C, H, W), dtype=jnp.float32)
    roll = 4  # RandomRoll(roll=4)

    y, (sh, sw) = random_roll(x, roll, k_roll)
    y = jax.block_until_ready(y)

    # Reference: torch.roll(x, (sh, sw), dims=(2, 3)) == jnp.roll(..., axis=(2, 3))
    expected = jnp.roll(x, (int(sh), int(sw)), axis=(2, 3))
    assert y.shape == x.shape and y.dtype == x.dtype
    assert bool(jnp.array_equal(y, expected)), "mismatch vs jnp.roll reference"

    print("KERNEL_OK")
</pallas_src>

<mosaic_0001>
module attributes {stable_mosaic.version = 11 : i64} {
  func.func @_roll_kernel(%arg0: i32, %arg1: memref<3xi32, #tpu.memory_space<smem>>, %arg2: memref<8x256xf32, #tpu.memory_space<vmem>>, %arg3: memref<8x256xf32, #tpu.memory_space<vmem>>) attributes {dimension_semantics = [#tpu.dimension_semantics<parallel>], iteration_bounds = array<i64: 1>, scalar_prefetch = 1 : i64, scratch_operands = 0 : i64, tpu.core_type = #tpu.core_type<tc>, window_params = [{transform_indices = @transform_0, window_bounds = array<i64: 8, 256>}, {transform_indices = @transform_1, window_bounds = array<i64: 8, 256>}]} {
    %c0 = arith.constant 0 : index
    %0 = memref.load %arg1[%c0] : memref<3xi32, #tpu.memory_space<smem>>
    %c1 = arith.constant 1 : index
    %1 = memref.load %arg1[%c1] : memref<3xi32, #tpu.memory_space<smem>>
    %c2 = arith.constant 2 : index
    %2 = memref.load %arg1[%c2] : memref<3xi32, #tpu.memory_space<smem>>
    %c0_0 = arith.constant 0 : index
    %c0_1 = arith.constant 0 : index
    %3 = vector.load %arg2[%c0_0, %c0_1] : memref<8x256xf32, #tpu.memory_space<vmem>>, vector<8x256xf32>
    %4 = tpu.dynamic_rotate %3 by %1 dim 1 : vector<8x256xf32>, i32 -> vector<8x256xf32>
    %5 = tpu.dynamic_rotate %3 by %2 dim 1 : vector<8x256xf32>, i32 -> vector<8x256xf32>
    %6 = tpu.iota {dimensions = array<i32: 1>} : vector<8x256xi32>
    %c16_i32 = arith.constant 16 : i32
    %c0_i32 = arith.constant 0 : i32
    %7 = arith.cmpi eq, %c16_i32, %c0_i32 : i32
    %c1_i32 = arith.constant 1 : i32
    %8 = arith.select %7, %c1_i32, %c16_i32 : i32
    %9 = vector.broadcast %8 : i32 to vector<8x256xi32>
    %10 = arith.remsi %6, %9 : vector<8x256xi32>
    %c0_i32_2 = arith.constant 0 : i32
    %11 = vector.broadcast %c0_i32_2 : i32 to vector<8x256xi32>
    %12 = arith.cmpi ne, %10, %11 : vector<8x256xi32>
    %c0_i32_3 = arith.constant 0 : i32
    %13 = vector.broadcast %c0_i32_3 : i32 to vector<8x256xi32>
    %14 = arith.cmpi slt, %10, %13 : vector<8x256xi32>
    %c0_i32_4 = arith.constant 0 : i32
    %15 = arith.cmpi slt, %8, %c0_i32_4 : i32
    %16 = vector.broadcast %15 : i1 to vector<8x256xi1>
    %17 = vector.broadcast %16 : vector<8x256xi1> to vector<8x256xi1>
    %18 = arith.xori %14, %17 : vector<8x256xi1>
    %19 = arith.andi %18, %12 : vector<8x256xi1>
    %20 = vector.broadcast %8 : i32 to vector<8x256xi32>
    %21 = arith.addi %10, %20 : vector<8x256xi32>
    %22 = arith.select %19, %21, %10 : vector<8x256xi1>, vector<8x256xi32>
    %23 = vector.broadcast %0 : i32 to vector<8x256xi32>
    %24 = arith.cmpi slt, %22, %23 : vector<8x256xi32>
    %25 = arith.select %24, %5, %4 : vector<8x256xi1>, vector<8x256xf32>
    %c0_5 = arith.constant 0 : index
    %c0_6 = arith.constant 0 : index
    %26 = vector.load %arg3[%c0_5, %c0_6] : memref<8x256xf32, #tpu.memory_space<vmem>>, vector<8x256xf32>
    tpu.vector_store %arg3[%c0_5, %c0_6], %25 {strides = array<i32>} : memref<8x256xf32, #tpu.memory_space<vmem>>, vector<8x256xf32>,
    return
  }
  func.func @transform_0(%arg0: i32, %arg1: memref<3xi32, #tpu.memory_space<smem>>) -> (i32, i32) {
    %c0_i32 = arith.constant 0 : i32
    %c0_i32_0 = arith.constant 0 : i32
    return %arg0, %c0_i32 : i32, i32
  }
  func.func @transform_1(%arg0: i32, %arg1: memref<3xi32, #tpu.memory_space<smem>>) -> (i32, i32) {
    %c0_i32 = arith.constant 0 : i32
    %c0_i32_0 = arith.constant 0 : i32
    return %arg0, %c0_i32 : i32, i32
  }
}

</mosaic_0001>

<bundles_post_ra>
// kernel: tpu_custom_call.1
= control target key start
LH: loop header
LB: loop body
LE: loop exit
PB: predicated region body
PF: predicated region fallthrough
CT: control target
= control target key end

     0   :  { %s231_s0 = inlined_call_operand.hbm [shape: s32[3], index: 0, kind: input, shape index: {}]   ;;  %s232_s1 = inlined_call_operand.hbm [shape: f32[8,256], index: 1, kind: input, shape index: {}]   ;;  %s233_s2 = inlined_call_operand.hbm [shape: f32[8,256], index: 2, kind: output, shape index: {}]  }
   0x1   :  { %s117_s11 = scalar_lea.hbm %s231_s0, 16 }
   0x2   :  { %p118_p0 = scmp.ne.s32.totalorder %s231_s0, %s117_s11  ;;  %p121_p1 = scmp.lt.u32.totalorder %s117_s11, %s231_s0 }
   0x4   :  { %p123_p2 = pnand %p121_p1, %p118_p0 }
   0x6   :  { %126 = shalt.err (!%p123_p2)  }
   0x7   :  { %s177_s16 = smov [#allocation3]  }
   0x8   :  { %8 = dma.hbm_to_smem %s231_s0, 16, %s177_s16, [#allocation2] }
   0x9   :  { %171 = dma.done.wait [#allocation2], 16 }
   0xa   :  { %172 = vsyncadd [#allocation2], 4294967280 }
   0xb   :  { %10 = sfence }
   0xc   :  { %11 = vsyncpa [#allocation5], 0 }
   0xd   :  { %12 = vsyncpa [#allocation6], 0  ;;  %s178_s19 = smov [#allocation4]   ;;  %s127_s23 = scalar_lea.hbm %s232_s1, 256 }
   0xe   :  { %s19_s20 = sshll.u32 %s178_s19, 4  ;;  %p128_p3 = scmp.ne.s32.totalorder %s232_s1, %s127_s23  ;;  %s20_s20 = int_to_ptr.vmem [resolvable:$true] %s19_s20 }
   0xf   :  { %p131_p4 = scmp.lt.u32.totalorder %s127_s23, %s232_s1 }
  0x11   :  { %p133_p5 = pnand %p131_p4, %p128_p3 }
  0x13   :  { %136 = shalt.err (!%p133_p5)
}
  0x14   :  { %s137_s0 = scalar_lea.vmem %s20_s20, 256  ;;  %p142_p7 = scmp.lt.s32.totalorder %s20_s20, %s20_s20 }
  0x15   :  { %p138_p6 = scmp.ne.s32.totalorder %s20_s20, %s137_s0  ;;  %p143_p8 = scmp.lt.s32.totalorder %s137_s0, %s137_s0 }
  0x17   :  { %p144_p9 = por %p143_p8, %p142_p7 }
  0x19   :  { %p145_p10 = pnand %p144_p9, %p138_p6 }
  0x1b   :  { %148 = shalt.err (!%p145_p10)
}
  0x1c   :  { %22 = dma.hbm_to_vmem [thread:$0]  %s232_s1, 256, %s20_s20, [#allocation5]  }
  0x1d   :  { %173 = dma.done.wait [#allocation5], 256  }
  0x1e   :  { %174 = vsyncadd [#allocation5], 4294967040  ;;  %s113_s30 = sld [smem:[#allocation3 + $0x2]]  ;;  %s112_s3 = sld [smem:[#allocation3 + $0x1]]  ;;  %v29_v0 = vld [vmem:[#allocation4] sm:$0xff]  ;;  %v30_v1 = vld [vmem:[#allocation4 + $0x8] sm:$0xff]  ;;  %v39_v2 = vlaneseq }
  0x1f   :  { %s26_s9 = sld [smem:[#allocation3]]  ;;  %s179_s12 = smov [#allocation7]  }
  0x20   :  { %v40_v3 = vand.u32 127, %v39_v2  ;;  %s103_s13 = sshll.u32 %s179_s12, 4  ;;  %s104_s13 = int_to_ptr.vmem [resolvable:$true] %s103_s13 }
  0x21   :  { %s149_s14 = scalar_lea.vmem %s104_s13, 256  ;;  %p154_p12 = scmp.lt.s32.totalorder %s104_s13, %s104_s13 }
  0x22   :  { %v65_v4 = vadd.s32 128, %v40_v3  ;;  %v70_v11 = vand.u32 15, %v40_v3  ;;  %p150_p11 = scmp.ne.s32.totalorder %s104_s13, %s149_s14  ;;  %p155_p13 = scmp.lt.s32.totalorder %s149_s14, %s149_s14 }
  0x24   :  { %s49_s4 = sand.u32 255, %s113_s30   ;;  %s31_s5 = sand.u32 255, %s112_s3   ;;  %v77_v12 = vand.u32 15, %v65_v4 }
  0x25   :  { %s50_s6 = sand.u32 127, %s49_s4   ;;  %s32_s7 = sand.u32 127, %s31_s5   ;;  %v90_v13 = vstv %s26_s9 }
  0x26   :  { %52 = vrot.lane.b32.xlu1 %v29_v0, %s50_s6  ;;  %34 = vrot.lane.b32.xlu0 %v29_v0, %s32_s7  ;;  %s51_s8 = sshrl.u32 %s49_s4, 7  ;;  %s33_s10 = sshrl.u32 %s31_s5, 7  ;;  %v56_v5 = vstv %s50_s6  ;;  %v38_v7 = vstv %s32_s7  ;;  %vm91_vm4 = vcmp.lt.s32.totalorder %v70_v11, %v90_v13  ;;  %vm92_vm5 = vcmp.lt.s32.totalorder %v77_v12, %v90_v13 }
  0x27   :  { %s60_s1 = sand.u32 1, %s51_s8  ;;  %s44_s11 = sand.u32 1, %s33_s10  ;;  %vm57_vm0 = vcmp.lt.s32.totalorder %v40_v3, %v56_v5  ;;  %vm41_vm2 = vcmp.lt.s32.totalorder %v40_v3, %v38_v7 }
  0x28   :  { %v61_v6 = vstv %s60_s1  ;;  %v45_v9 = vstv %s44_s11  ;;  %p156_p0 = por %p155_p13, %p154_p12 }
  0x29   :  { %vm62_vm1 = vcmp.ne.s32.totalorder %v61_v6, 0  ;;  %vm46_vm3 = vcmp.ne.s32.totalorder %v45_v9, 0 }
  0x2a   :  { %54 = vrot.lane.b32.xlu1 %v30_v1, %s50_s6  ;;  %36 = vrot.lane.b32.xlu0 %v30_v1, %s32_s7  ;;  %p157_p1 = pnand %p156_p0, %p150_p11 }
  0x98   :  { %v53_v8 = vpop.permute.xlu1 %52  ;;  %v35_v10 = vpop.permute.xlu0 %34 }
  0x9c   :  { %v55_v14 = vpop.permute.xlu1 %54  ;;  %v37_v17 = vpop.permute.xlu0 %36 }
  0x9d   :  { %v58_v15 = vsel %vm57_vm0, %v53_v8, %v55_v14  ;;  %v59_v16 = vsel %vm57_vm0, %v55_v14, %v53_v8  ;;  %v42_v20 = vsel %vm41_vm2, %v35_v10, %v37_v17  ;;  %v43_v21 = vsel %vm41_vm2, %v37_v17, %v35_v10 }
  0x9e   :  { %v63_v18 = vsel %vm62_vm1, %v58_v15, %v59_v16  ;;  %v64_v19 = vsel %vm62_vm1, %v59_v16, %v58_v15  ;;  %v47_v22 = vsel %vm46_vm3, %v42_v20, %v43_v21  ;;  %v48_v23 = vsel %vm46_vm3, %v43_v21, %v42_v20 }
  0x9f   :  { %v93_v24 = vsel %vm91_vm4, %v63_v18, %v47_v22  ;;  %v94_v25 = vsel %vm92_vm5, %v64_v19, %v48_v23 }
  0xa0   :  { %95 = vst [vmem:[#allocation7] sm:$0xff] %v93_v24  ;;  %96 = vst [vmem:[#allocation7 + $0x8] sm:$0xff] %v94_v25 }
  0xa1   :  { %160 = shalt.err (!%p157_p1)
}
  0xa2   :  { %s161_s17 = scalar_lea.hbm %s233_s2, 256 }
  0xa3   :  { %p162_p2 = scmp.ne.s32.totalorder %s233_s2, %s161_s17  ;;  %p165_p3 = scmp.lt.u32.totalorder %s161_s17, %s233_s2 }
  0xa5   :  { %p167_p4 = pnand %p165_p3, %p162_p2 }
  0xa7   :  { %170 = shalt.err (!%p167_p4)
}
  0xa8   :  { %106 = dma.vmem_to_hbm [thread:$0]  %s104_s13, 256, %s233_s2, [#allocation6]  }
  0xa9   :  { %175 = dma.done.wait [#allocation6], 256  }
  0xaa   :  { %176 = vsyncadd [#allocation6], 4294967040 }
  0xab   :  { %110 = vsyncpa [#allocation5], 1 }
  0xac   :  { %111 = vsyncpa [#allocation6], 1 }

</bundles_post_ra>
